<compile_context>
chip_gen: v7x
topology: tpu7x:2x2x1
jax: 0.10.0
libtpu: 0.0.40
codegen_flags: <defaults>
</compile_context>

<pallas_src>
import jax
import jax.numpy as jnp
from jax.experimental import pallas as pl
from jax.experimental.pallas import tpu as pltpu

BN_EPS = 1e-5
LEAKY_SLOPE = 0.1
LANE = 128


def _round_up(x, m):
    return ((x + m - 1) // m) * m


# ----------------------------------------------------------------------------
# One-time parameter packing (hoisted out of the forward path).
# ----------------------------------------------------------------------------
def prepare_params(params):
    """Packs all Encoder parameters into two lane-dense f32 slabs.

    Returns (plan, w_slab, aux_slab); `plan` is a dict of static Python ints
    describing the slab layout, consumed by the kernel builder / wrapper.
    """
    embeds = params["embeds"]
    hidden = params["hidden"]
    emb_dims = [int(t.shape[1]) for t in embeds]
    in_dim = int(hidden[0]["w"].shape[0])
    n_cont = in_dim - sum(emb_dims)
    dims = [in_dim] + [int(l["w"].shape[1]) for l in hidden]
    latent = int(params["mu_w"].shape[1])

    # ---- weight slab: hidden Linear weights + fused mu|logvar head weight ----
    w_blocks, layer_w, row = [], [], 0
    for l in hidden:
        w = l["w"].astype(jnp.float32)
        k, d_out = int(w.shape[0]), int(w.shape[1])
        k_pad = _round_up(k, 8)
        w_blocks.append(jnp.zeros((k_pad, LANE), jnp.float32).at[:k, :d_out].set(w))
        layer_w.append((row, k_pad, d_out))
        row += k_pad
    w_head = jnp.concatenate([params["mu_w"], params["lv_w"]], axis=1).astype(jnp.float32)
    k, d2 = int(w_head.shape[0]), int(w_head.shape[1])
    k_pad = _round_up(k, 8)
    w_blocks.append(jnp.zeros((k_pad, LANE), jnp.float32).at[:k, :d2].set(w_head))
    head_w = (row, k_pad, d2)
    w_slab = jnp.concatenate(w_blocks, axis=0)

    # ---- aux slab: embedding tables, BN gamma/beta rows, fused head bias ----
    aux_blocks, emb_layout, arow = [], [], 0
    for t, d in zip(embeds, emb_dims):
        n = int(t.shape[0])
        n_pad = _round_up(n, 8)
        aux_blocks.append(
            jnp.zeros((n_pad, LANE), jnp.float32).at[:n, :d].set(t.astype(jnp.float32)))
        emb_layout.append((arow, n, d))
        arow += n_pad
    bn_rows = []
    for l in hidden:
        d_out = int(l["w"].shape[1])
        aux_blocks.append(
            jnp.zeros((1, LANE), jnp.float32).at[:, :d_out].set(l["gamma"].astype(jnp.float32)))
        aux_blocks.append(
            jnp.zeros((1, LANE), jnp.float32).at[:, :d_out].set(l["beta"].astype(jnp.float32)))
        bn_rows.append((arow, arow + 1))
        arow += 2
    b_head = jnp.concatenate([params["mu_b"], params["lv_b"]], axis=1).astype(jnp.float32)
    aux_blocks.append(jnp.zeros((1, LANE), jnp.float32).at[:, :d2].set(b_head))
    head_b_row = arow
    arow += 1
    pad_rows = _round_up(arow, 8) - arow
    if pad_rows:
        aux_blocks.append(jnp.zeros((pad_rows, LANE), jnp.float32))
    aux_slab = jnp.concatenate(aux_blocks, axis=0)

    plan = dict(
        emb_layout=tuple(emb_layout), n_cont=n_cont, in_dim=in_dim,
        dims=tuple(dims), latent=latent,
        layer_w=tuple(layer_w), head_w=head_w,
        bn_rows=tuple(bn_rows), head_b_row=head_b_row,
        out_width=_round_up(in_dim + 2 * latent, LANE),
    )
    return plan, w_slab, aux_slab


# ----------------------------------------------------------------------------
# Pallas kernel
# ----------------------------------------------------------------------------
def _make_encoder_kernel(plan):
    emb_layout = plan["emb_layout"]
    in_dim = plan["in_dim"]
    layer_w = plan["layer_w"]
    head_w = plan["head_w"]
    bn_rows = plan["bn_rows"]
    head_b_row = plan["head_b_row"]
    out_width = plan["out_width"]

    def kernel(x_cat_ref, x_cont_ref, w_ref, aux_ref, out_ref):
        B = x_cont_ref.shape[0]

        # ---- fused embedding lookup: indices are SMEM scalars (scalar
        #      prefetch); tables live in the aux slab.  Tiny vocabularies, so
        #      gather = exact masked row-select accumulated on the VPU. ----
        cols = []
        for t, (row_off, n_cats, emb_dim) in enumerate(emb_layout):
            idx_col = jnp.concatenate(
                [jnp.full((1, 1), x_cat_ref[b, t], jnp.int32) for b in range(B)],
                axis=0)                                            # (B, 1) int32
            acc = jnp.zeros((B, LANE), jnp.float32)
            for r in range(n_cats):
                row = aux_ref[row_off + r:row_off + r + 1, :]      # (1, 128) static
                acc = acc + (idx_col == r).astype(jnp.float32) * row
            cols.append(acc[:, :emb_dim])
        x = jnp.concatenate(cols + [x_cont_ref[...].astype(jnp.float32)], axis=1)

        # ---- hidden layers: Linear (bias folded into BN mean-subtraction) ->
        #      BatchNorm1d (training batch stats, biased var) -> LeakyReLU(0.1)
        h = x
        d_in = in_dim
        for (row0, k_pad, d_out), (g_row, b_row) in zip(layer_w, bn_rows):
            if k_pad > d_in:   # pad K up to the slab's 8-row-aligned block
                h = jnp.concatenate(
                    [h, jnp.zeros((B, k_pad - d_in), jnp.float32)], axis=1)
            z = jnp.dot(h, w_ref[row0:row0 + k_pad, :d_out],
                        preferred_element_type=jnp.float32)
            mean = jnp.mean(z, axis=0, keepdims=True)
            zc = z - mean
            var = jnp.mean(zc * zc, axis=0, keepdims=True)         # centered, stable
            inv = jax.lax.rsqrt(var + BN_EPS)
            gamma = aux_ref[g_row:g_row + 1, :d_out]
            beta = aux_ref[b_row:b_row + 1, :d_out]
            zn = zc * (gamma * inv) + beta
            h = jnp.maximum(zn, LEAKY_SLOPE * zn)                  # LeakyReLU(0.1)
            d_in = d_out

        # ---- fused mu|logvar head (f32; logvar accuracy matters downstream) --
        row0, k_pad, d2 = head_w
        if k_pad > d_in:
            h = jnp.concatenate(
                [h, jnp.zeros((B, k_pad - d_in), jnp.float32)], axis=1)
        head = (jnp.dot(h, w_ref[row0:row0 + k_pad, :d2],
                        preferred_element_type=jnp.float32)
                + aux_ref[head_b_row:head_b_row + 1, :d2])

        # ---- single lane-dense store: [ x | mu|logvar | 0-pad ] -> (B, 128) --
        pad = out_width - in_dim - d2
        out_ref[...] = jnp.concatenate(
            [x, head, jnp.zeros((B, pad), jnp.float32)], axis=1)

    return kernel


# ----------------------------------------------------------------------------
# Wrapper (jitted end-to-end; single pallas_call, no XLA glue on the data path)
# ----------------------------------------------------------------------------
def build_encoder_forward(plan):
    kernel = _make_encoder_kernel(plan)
    in_dim, latent, out_width = plan["in_dim"], plan["latent"], plan["out_width"]
    dims = plan["dims"]

    @jax.jit
    def forward(x_cont, x_cat, w_slab, aux_slab):
        B = x_cont.shape[0]
        flops = 2 * B * (sum(dims[i] * dims[i + 1] for i in range(len(dims) - 1))
                         + dims[-1] * 2 * latent)
        bytes_accessed = 4 * (x_cont.size + x_cat.size + w_slab.size
                              + aux_slab.size + B * out_width)
        vmem = pl.BlockSpec(memory_space=pltpu.MemorySpace.VMEM)
        out = pl.pallas_call(
            kernel,
            out_shape=jax.ShapeDtypeStruct((B, out_width), jnp.float32),
            grid_spec=pltpu.PrefetchScalarGridSpec(
                num_scalar_prefetch=1,            # x_cat -> SMEM
                grid=(),
                in_specs=[vmem, vmem, vmem],      # x_cont, w_slab, aux_slab
                out_specs=vmem,
            ),
            cost_estimate=pl.CostEstimate(
                flops=flops,
                transcendentals=sum(dims[1:]),    # rsqrt per BN feature
                bytes_accessed=bytes_accessed),
        )(x_cat, x_cont, w_slab, aux_slab)
        x = out[:, :in_dim]
        mu = out[:, in_dim:in_dim + latent]
        logvar = out[:, in_dim + latent:in_dim + 2 * latent]
        return mu, logvar, x

    return forward


# ----------------------------------------------------------------------------
# Deterministic parameter construction (synthetic weights, no checkpoint)
# ----------------------------------------------------------------------------
def make_params(key, embedding_sizes, n_cont, layer_sizes, latent_dim):
    keys = jax.random.split(key, 64)
    ki = iter(range(64))

    embeds = [
        0.1 * jax.random.normal(keys[next(ki)], (n_cats, emb), dtype=jnp.float32)
        for n_cats, emb in embedding_sizes
    ]
    in_dim = sum(emb for _, emb in embedding_sizes) + n_cont
    dims = [in_dim] + list(layer_sizes)

    hidden = []
    for i in range(len(dims) - 1):
        d_in, d_out = dims[i], dims[i + 1]
        hidden.append(dict(
            w=jax.random.normal(keys[next(ki)], (d_in, d_out), dtype=jnp.float32) / jnp.sqrt(d_in),
            b=0.01 * jax.random.normal(keys[next(ki)], (1, d_out), dtype=jnp.float32),
            gamma=1.0 + 0.05 * jax.random.normal(keys[next(ki)], (1, d_out), dtype=jnp.float32),
            beta=0.05 * jax.random.normal(keys[next(ki)], (1, d_out), dtype=jnp.float32),
        ))

    d_last = dims[-1]
    return dict(
        embeds=embeds,
        hidden=hidden,
        mu_w=jax.random.normal(keys[next(ki)], (d_last, latent_dim), dtype=jnp.float32) / jnp.sqrt(d_last),
        mu_b=0.01 * jax.random.normal(keys[next(ki)], (1, latent_dim), dtype=jnp.float32),
        lv_w=jax.random.normal(keys[next(ki)], (d_last, latent_dim), dtype=jnp.float32) / jnp.sqrt(d_last),
        lv_b=0.01 * jax.random.normal(keys[next(ki)], (1, latent_dim), dtype=jnp.float32),
    )


# ----------------------------------------------------------------------------
# Pure-JAX reference (mirrors the PyTorch forward, full f32, bias included)
# ----------------------------------------------------------------------------
def encoder_reference(x_cont, x_cat, params):
    embeds = [jnp.take(tbl, x_cat[:, i], axis=0) for i, tbl in enumerate(params["embeds"])]
    x = jnp.concatenate(embeds + [x_cont], axis=1).astype(jnp.float32)
    h = x
    for layer in params["hidden"]:
        z = h @ layer["w"] + layer["b"]
        mean = jnp.mean(z, axis=0, keepdims=True)
        var = jnp.mean((z - mean) ** 2, axis=0, keepdims=True)
        z = (z - mean) / jnp.sqrt(var + BN_EPS)
        z = z * layer["gamma"] + layer["beta"]
        h = jnp.where(z > 0, z, LEAKY_SLOPE * z)
    mu = h @ params["mu_w"] + params["mu_b"]
    lv = h @ params["lv_w"] + params["lv_b"]
    return mu, lv, x


# ----------------------------------------------------------------------------
if __name__ == "__main__":
    # Small hparams consistent with the module:
    #   embedding_sizes=[(10,4),(7,3)], cont_vars -> 5, layer_sizes="32,32",
    #   batch_norm=True, latent_dim=8
    embedding_sizes = [(10, 4), (7, 3)]
    n_cont = 5
    layer_sizes = (32, 32)
    latent_dim = 8
    batch = 8

    key = jax.random.PRNGKey(0)
    k_param, k_cont, k_cat0, k_cat1 = jax.random.split(key, 4)

    params = make_params(k_param, embedding_sizes, n_cont, layer_sizes, latent_dim)

    # One-time packing (hoisted out of the forward path) + jitted forward.
    plan, w_slab, aux_slab = prepare_params(params)
    encoder_forward = build_encoder_forward(plan)

    x_cont = jax.random.normal(k_cont, (batch, n_cont), dtype=jnp.float32)
    x_cat = jnp.stack(
        [jax.random.randint(k_cat0, (batch,), 0, embedding_sizes[0][0]),
         jax.random.randint(k_cat1, (batch,), 0, embedding_sizes[1][0])],
        axis=1).astype(jnp.int32)

    mu, logvar, x = encoder_forward(x_cont, x_cat, w_slab, aux_slab)
    jax.block_until_ready((mu, logvar, x))

    mu_ref, lv_ref, x_ref = encoder_reference(x_cont, x_cat, params)
    # `x` is exact (masked-select gather + f32 passthrough).  mu/logvar allow
    # for MXU f32-pass rounding (both kernel and XLA reference may execute f32
    # matmuls as bf16 passes on TPU) and the analytic bias/BN cancellation.
    assert jnp.allclose(x, x_ref, atol=1e-6, rtol=1e-6)
    assert jnp.allclose(mu, mu_ref, atol=1e-2, rtol=1e-2)
    assert jnp.allclose(logvar, lv_ref, atol=1e-2, rtol=1e-2)

    print("KERNEL_OK")
</pallas_src>

<mosaic_0001>
module attributes {stable_mosaic.version = 11 : i64} {
  func.func @kernel(%arg0: memref<8x2xi32, #tpu.memory_space<smem>>, %arg1: memref<8x5xf32, #tpu.memory_space<vmem>>, %arg2: memref<80x128xf32, #tpu.memory_space<vmem>>, %arg3: memref<32x128xf32, #tpu.memory_space<vmem>>, %arg4: memref<8x128xf32, #tpu.memory_space<vmem>>) attributes {dimension_semantics = [], scalar_prefetch = 1 : i64, scratch_operands = 0 : i64, tpu.core_type = #tpu.core_type<tc>} {
    %c0 = arith.constant 0 : index
    %c0_0 = arith.constant 0 : index
    %0 = memref.load %arg0[%c0, %c0_0] : memref<8x2xi32, #tpu.memory_space<smem>>
    %1 = vector.broadcast %0 : i32 to vector<1x1xi32>
    %c1 = arith.constant 1 : index
    %c0_1 = arith.constant 0 : index
    %2 = memref.load %arg0[%c1, %c0_1] : memref<8x2xi32, #tpu.memory_space<smem>>
    %3 = vector.broadcast %2 : i32 to vector<1x1xi32>
    %c2 = arith.constant 2 : index
    %c0_2 = arith.constant 0 : index
    %4 = memref.load %arg0[%c2, %c0_2] : memref<8x2xi32, #tpu.memory_space<smem>>
    %5 = vector.broadcast %4 : i32 to vector<1x1xi32>
    %c3 = arith.constant 3 : index
    %c0_3 = arith.constant 0 : index
    %6 = memref.load %arg0[%c3, %c0_3] : memref<8x2xi32, #tpu.memory_space<smem>>
    %7 = vector.broadcast %6 : i32 to vector<1x1xi32>
    %c4 = arith.constant 4 : index
    %c0_4 = arith.constant 0 : index
    %8 = memref.load %arg0[%c4, %c0_4] : memref<8x2xi32, #tpu.memory_space<smem>>
    %9 = vector.broadcast %8 : i32 to vector<1x1xi32>
    %c5 = arith.constant 5 : index
    %c0_5 = arith.constant 0 : index
    %10 = memref.load %arg0[%c5, %c0_5] : memref<8x2xi32, #tpu.memory_space<smem>>
    %11 = vector.broadcast %10 : i32 to vector<1x1xi32>
    %c6 = arith.constant 6 : index
    %c0_6 = arith.constant 0 : index
    %12 = memref.load %arg0[%c6, %c0_6] : memref<8x2xi32, #tpu.memory_space<smem>>
    %13 = vector.broadcast %12 : i32 to vector<1x1xi32>
    %c7 = arith.constant 7 : index
    %c0_7 = arith.constant 0 : index
    %14 = memref.load %arg0[%c7, %c0_7] : memref<8x2xi32, #tpu.memory_space<smem>>
    %15 = vector.broadcast %14 : i32 to vector<1x1xi32>
    %16 = tpu.concatenate %1, %3, %5, %7, %9, %11, %13, %15 in 0 : vector<1x1xi32>, vector<1x1xi32>, vector<1x1xi32>, vector<1x1xi32>, vector<1x1xi32>, vector<1x1xi32>, vector<1x1xi32>, vector<1x1xi32> -> vector<8x1xi32>
    %cst = arith.constant 0.000000e+00 : f32
    %17 = vector.broadcast %cst : f32 to vector<8x128xf32>
    %c0_8 = arith.constant 0 : index
    %c0_9 = arith.constant 0 : index
    %18 = vector.load %arg3[%c0_8, %c0_9] : memref<32x128xf32, #tpu.memory_space<vmem>>, vector<1x128xf32>
    %c0_i32 = arith.constant 0 : i32
    %19 = vector.broadcast %c0_i32 : i32 to vector<8x1xi32>
    %20 = arith.cmpi eq, %16, %19 : vector<8x1xi32>
    %21 = arith.extui %20 : vector<8x1xi1> to vector<8x1xi32>
    %22 = arith.sitofp %21 : vector<8x1xi32> to vector<8x1xf32>
    %23 = vector.broadcast %22 : vector<8x1xf32> to vector<8x128xf32>
    %24 = vector.broadcast %18 : vector<1x128xf32> to vector<8x128xf32>
    %25 = arith.mulf %23, %24 : vector<8x128xf32>
    %26 = arith.addf %17, %25 : vector<8x128xf32>
    %c1_10 = arith.constant 1 : index
    %c0_11 = arith.constant 0 : index
    %27 = vector.load %arg3[%c1_10, %c0_11] : memref<32x128xf32, #tpu.memory_space<vmem>>, vector<1x128xf32>
    %c1_i32 = arith.constant 1 : i32
    %28 = vector.broadcast %c1_i32 : i32 to vector<8x1xi32>
    %29 = arith.cmpi eq, %16, %28 : vector<8x1xi32>
    %30 = arith.extui %29 : vector<8x1xi1> to vector<8x1xi32>
    %31 = arith.sitofp %30 : vector<8x1xi32> to vector<8x1xf32>
    %32 = vector.broadcast %31 : vector<8x1xf32> to vector<8x128xf32>
    %33 = vector.broadcast %27 : vector<1x128xf32> to vector<8x128xf32>
    %34 = arith.mulf %32, %33 : vector<8x128xf32>
    %35 = arith.addf %26, %34 : vector<8x128xf32>
    %c2_12 = arith.constant 2 : index
    %c0_13 = arith.constant 0 : index
    %36 = vector.load %arg3[%c2_12, %c0_13] : memref<32x128xf32, #tpu.memory_space<vmem>>, vector<1x128xf32>
    %c2_i32 = arith.constant 2 : i32
    %37 = vector.broadcast %c2_i32 : i32 to vector<8x1xi32>
    %38 = arith.cmpi eq, %16, %37 : vector<8x1xi32>
    %39 = arith.extui %38 : vector<8x1xi1> to vector<8x1xi32>
    %40 = arith.sitofp %39 : vector<8x1xi32> to vector<8x1xf32>
    %41 = vector.broadcast %40 : vector<8x1xf32> to vector<8x128xf32>
    %42 = vector.broadcast %36 : vector<1x128xf32> to vector<8x128xf32>
    %43 = arith.mulf %41, %42 : vector<8x128xf32>
    %44 = arith.addf %35, %43 : vector<8x128xf32>
    %c3_14 = arith.constant 3 : index
    %c0_15 = arith.constant 0 : index
    %45 = vector.load %arg3[%c3_14, %c0_15] : memref<32x128xf32, #tpu.memory_space<vmem>>, vector<1x128xf32>
    %c3_i32 = arith.constant 3 : i32
    %46 = vector.broadcast %c3_i32 : i32 to vector<8x1xi32>
    %47 = arith.cmpi eq, %16, %46 : vector<8x1xi32>
    %48 = arith.extui %47 : vector<8x1xi1> to vector<8x1xi32>
    %49 = arith.sitofp %48 : vector<8x1xi32> to vector<8x1xf32>
    %50 = vector.broadcast %49 : vector<8x1xf32> to vector<8x128xf32>
    %51 = vector.broadcast %45 : vector<1x128xf32> to vector<8x128xf32>
    %52 = arith.mulf %50, %51 : vector<8x128xf32>
    %53 = arith.addf %44, %52 : vector<8x128xf32>
    %c4_16 = arith.constant 4 : index
    %c0_17 = arith.constant 0 : index
    %54 = vector.load %arg3[%c4_16, %c0_17] : memref<32x128xf32, #tpu.memory_space<vmem>>, vector<1x128xf32>
    %c4_i32 = arith.constant 4 : i32
    %55 = vector.broadcast %c4_i32 : i32 to vector<8x1xi32>
    %56 = arith.cmpi eq, %16, %55 : vector<8x1xi32>
    %57 = arith.extui %56 : vector<8x1xi1> to vector<8x1xi32>
    %58 = arith.sitofp %57 : vector<8x1xi32> to vector<8x1xf32>
    %59 = vector.broadcast %58 : vector<8x1xf32> to vector<8x128xf32>
    %60 = vector.broadcast %54 : vector<1x128xf32> to vector<8x128xf32>
    %61 = arith.mulf %59, %60 : vector<8x128xf32>
    %62 = arith.addf %53, %61 : vector<8x128xf32>
    %c5_18 = arith.constant 5 : index
    %c0_19 = arith.constant 0 : index
    %63 = vector.load %arg3[%c5_18, %c0_19] : memref<32x128xf32, #tpu.memory_space<vmem>>, vector<1x128xf32>
    %c5_i32 = arith.constant 5 : i32
    %64 = vector.broadcast %c5_i32 : i32 to vector<8x1xi32>
    %65 = arith.cmpi eq, %16, %64 : vector<8x1xi32>
    %66 = arith.extui %65 : vector<8x1xi1> to vector<8x1xi32>
    %67 = arith.sitofp %66 : vector<8x1xi32> to vector<8x1xf32>
    %68 = vector.broadcast %67 : vector<8x1xf32> to vector<8x128xf32>
    %69 = vector.broadcast %63 : vector<1x128xf32> to vector<8x128xf32>
    %70 = arith.mulf %68, %69 : vector<8x128xf32>
    %71 = arith.addf %62, %70 : vector<8x128xf32>
    %c6_20 = arith.constant 6 : index
    %c0_21 = arith.constant 0 : index
    %72 = vector.load %arg3[%c6_20, %c0_21] : memref<32x128xf32, #tpu.memory_space<vmem>>, vector<1x128xf32>
    %c6_i32 = arith.constant 6 : i32
    %73 = vector.broadcast %c6_i32 : i32 to vector<8x1xi32>
    %74 = arith.cmpi eq, %16, %73 : vector<8x1xi32>
    %75 = arith.extui %74 : vector<8x1xi1> to vector<8x1xi32>
    %76 = arith.sitofp %75 : vector<8x1xi32> to vector<8x1xf32>
    %77 = vector.broadcast %76 : vector<8x1xf32> to vector<8x128xf32>
    %78 = vector.broadcast %72 : vector<1x128xf32> to vector<8x128xf32>
    %79 = arith.mulf %77, %78 : vector<8x128xf32>
    %80 = arith.addf %71, %79 : vector<8x128xf32>
    %c7_22 = arith.constant 7 : index
    %c0_23 = arith.constant 0 : index
    %81 = vector.load %arg3[%c7_22, %c0_23] : memref<32x128xf32, #tpu.memory_space<vmem>>, vector<1x128xf32>
    %c7_i32 = arith.constant 7 : i32
    %82 = vector.broadcast %c7_i32 : i32 to vector<8x1xi32>
    %83 = arith.cmpi eq, %16, %82 : vector<8x1xi32>
    %84 = arith.extui %83 : vector<8x1xi1> to vector<8x1xi32>
    %85 = arith.sitofp %84 : vector<8x1xi32> to vector<8x1xf32>
    %86 = vector.broadcast %85 : vector<8x1xf32> to vector<8x128xf32>
    %87 = vector.broadcast %81 : vector<1x128xf32> to vector<8x128xf32>
    %88 = arith.mulf %86, %87 : vector<8x128xf32>
    %89 = arith.addf %80, %88 : vector<8x128xf32>
    %c8 = arith.constant 8 : index
    %c0_24 = arith.constant 0 : index
    %90 = vector.load %arg3[%c8, %c0_24] : memref<32x128xf32, #tpu.memory_space<vmem>>, vector<1x128xf32>
    %c8_i32 = arith.constant 8 : i32
    %91 = vector.broadcast %c8_i32 : i32 to vector<8x1xi32>
    %92 = arith.cmpi eq, %16, %91 : vector<8x1xi32>
    %93 = arith.extui %92 : vector<8x1xi1> to vector<8x1xi32>
    %94 = arith.sitofp %93 : vector<8x1xi32> to vector<8x1xf32>
    %95 = vector.broadcast %94 : vector<8x1xf32> to vector<8x128xf32>
    %96 = vector.broadcast %90 : vector<1x128xf32> to vector<8x128xf32>
    %97 = arith.mulf %95, %96 : vector<8x128xf32>
    %98 = arith.addf %89, %97 : vector<8x128xf32>
    %c9 = arith.constant 9 : index
    %c0_25 = arith.constant 0 : index
    %99 = vector.load %arg3[%c9, %c0_25] : memref<32x128xf32, #tpu.memory_space<vmem>>, vector<1x128xf32>
    %c9_i32 = arith.constant 9 : i32
    %100 = vector.broadcast %c9_i32 : i32 to vector<8x1xi32>
    %101 = arith.cmpi eq, %16, %100 : vector<8x1xi32>
    %102 = arith.extui %101 : vector<8x1xi1> to vector<8x1xi32>
    %103 = arith.sitofp %102 : vector<8x1xi32> to vector<8x1xf32>
    %104 = vector.broadcast %103 : vector<8x1xf32> to vector<8x128xf32>
    %105 = vector.broadcast %99 : vector<1x128xf32> to vector<8x128xf32>
    %106 = arith.mulf %104, %105 : vector<8x128xf32>
    %107 = arith.addf %98, %106 : vector<8x128xf32>
    %108 = vector.extract_strided_slice %107 {offsets = [0, 0], sizes = [8, 4], strides = [1, 1]} : vector<8x128xf32> to vector<8x4xf32>
    %c0_26 = arith.constant 0 : index
    %c1_27 = arith.constant 1 : index
    %109 = memref.load %arg0[%c0_26, %c1_27] : memref<8x2xi32, #tpu.memory_space<smem>>
    %110 = vector.broadcast %109 : i32 to vector<1x1xi32>
    %c1_28 = arith.constant 1 : index
    %c1_29 = arith.constant 1 : index
    %111 = memref.load %arg0[%c1_28, %c1_29] : memref<8x2xi32, #tpu.memory_space<smem>>
    %112 = vector.broadcast %111 : i32 to vector<1x1xi32>
    %c2_30 = arith.constant 2 : index
    %c1_31 = arith.constant 1 : index
    %113 = memref.load %arg0[%c2_30, %c1_31] : memref<8x2xi32, #tpu.memory_space<smem>>
    %114 = vector.broadcast %113 : i32 to vector<1x1xi32>
    %c3_32 = arith.constant 3 : index
    %c1_33 = arith.constant 1 : index
    %115 = memref.load %arg0[%c3_32, %c1_33] : memref<8x2xi32, #tpu.memory_space<smem>>
    %116 = vector.broadcast %115 : i32 to vector<1x1xi32>
    %c4_34 = arith.constant 4 : index
    %c1_35 = arith.constant 1 : index
    %117 = memref.load %arg0[%c4_34, %c1_35] : memref<8x2xi32, #tpu.memory_space<smem>>
    %118 = vector.broadcast %117 : i32 to vector<1x1xi32>
    %c5_36 = arith.constant 5 : index
    %c1_37 = arith.constant 1 : index
    %119 = memref.load %arg0[%c5_36, %c1_37] : memref<8x2xi32, #tpu.memory_space<smem>>
    %120 = vector.broadcast %119 : i32 to vector<1x1xi32>
    %c6_38 = arith.constant 6 : index
    %c1_39 = arith.constant 1 : index
    %121 = memref.load %arg0[%c6_38, %c1_39] : memref<8x2xi32, #tpu.memory_space<smem>>
    %122 = vector.broadcast %121 : i32 to vector<1x1xi32>
    %c7_40 = arith.constant 7 : index
    %c1_41 = arith.constant 1 : index
    %123 = memref.load %arg0[%c7_40, %c1_41] : memref<8x2xi32, #tpu.memory_space<smem>>
    %124 = vector.broadcast %123 : i32 to vector<1x1xi32>
    %125 = tpu.concatenate %110, %112, %114, %116, %118, %120, %122, %124 in 0 : vector<1x1xi32>, vector<1x1xi32>, vector<1x1xi32>, vector<1x1xi32>, vector<1x1xi32>, vector<1x1xi32>, vector<1x1xi32>, vector<1x1xi32> -> vector<8x1xi32>
    %cst_42 = arith.constant 0.000000e+00 : f32
    %126 = vector.broadcast %cst_42 : f32 to vector<8x128xf32>
    %c16 = arith.constant 16 : index
    %c0_43 = arith.constant 0 : index
    %127 = vector.load %arg3[%c16, %c0_43] : memref<32x128xf32, #tpu.memory_space<vmem>>, vector<1x128xf32>
    %c0_i32_44 = arith.constant 0 : i32
    %128 = vector.broadcast %c0_i32_44 : i32 to vector<8x1xi32>
    %129 = arith.cmpi eq, %125, %128 : vector<8x1xi32>
    %130 = arith.extui %129 : vector<8x1xi1> to vector<8x1xi32>
    %131 = arith.sitofp %130 : vector<8x1xi32> to vector<8x1xf32>
    %132 = vector.broadcast %131 : vector<8x1xf32> to vector<8x128xf32>
    %133 = vector.broadcast %127 : vector<1x128xf32> to vector<8x128xf32>
    %134 = arith.mulf %132, %133 : vector<8x128xf32>
    %135 = arith.addf %126, %134 : vector<8x128xf32>
    %c17 = arith.constant 17 : index
    %c0_45 = arith.constant 0 : index
    %136 = vector.load %arg3[%c17, %c0_45] : memref<32x128xf32, #tpu.memory_space<vmem>>, vector<1x128xf32>
    %c1_i32_46 = arith.constant 1 : i32
    %137 = vector.broadcast %c1_i32_46 : i32 to vector<8x1xi32>
    %138 = arith.cmpi eq, %125, %137 : vector<8x1xi32>
    %139 = arith.extui %138 : vector<8x1xi1> to vector<8x1xi32>
    %140 = arith.sitofp %139 : vector<8x1xi32> to vector<8x1xf32>
    %141 = vector.broadcast %140 : vector<8x1xf32> to vector<8x128xf32>
    %142 = vector.broadcast %136 : vector<1x128xf32> to vector<8x128xf32>
    %143 = arith.mulf %141, %142 : vector<8x128xf32>
    %144 = arith.addf %135, %143 : vector<8x128xf32>
    %c18 = arith.constant 18 : index
    %c0_47 = arith.constant 0 : index
    %145 = vector.load %arg3[%c18, %c0_47] : memref<32x128xf32, #tpu.memory_space<vmem>>, vector<1x128xf32>
    %c2_i32_48 = arith.constant 2 : i32
    %146 = vector.broadcast %c2_i32_48 : i32 to vector<8x1xi32>
    %147 = arith.cmpi eq, %125, %146 : vector<8x1xi32>
    %148 = arith.extui %147 : vector<8x1xi1> to vector<8x1xi32>
    %149 = arith.sitofp %148 : vector<8x1xi32> to vector<8x1xf32>
    %150 = vector.broadcast %149 : vector<8x1xf32> to vector<8x128xf32>
    %151 = vector.broadcast %145 : vector<1x128xf32> to vector<8x128xf32>
    %152 = arith.mulf %150, %151 : vector<8x128xf32>
    %153 = arith.addf %144, %152 : vector<8x128xf32>
    %c19 = arith.constant 19 : index
    %c0_49 = arith.constant 0 : index
    %154 = vector.load %arg3[%c19, %c0_49] : memref<32x128xf32, #tpu.memory_space<vmem>>, vector<1x128xf32>
    %c3_i32_50 = arith.constant 3 : i32
    %155 = vector.broadcast %c3_i32_50 : i32 to vector<8x1xi32>
    %156 = arith.cmpi eq, %125, %155 : vector<8x1xi32>
    %157 = arith.extui %156 : vector<8x1xi1> to vector<8x1xi32>
    %158 = arith.sitofp %157 : vector<8x1xi32> to vector<8x1xf32>
    %159 = vector.broadcast %158 : vector<8x1xf32> to vector<8x128xf32>
    %160 = vector.broadcast %154 : vector<1x128xf32> to vector<8x128xf32>
    %161 = arith.mulf %159, %160 : vector<8x128xf32>
    %162 = arith.addf %153, %161 : vector<8x128xf32>
    %c20 = arith.constant 20 : index
    %c0_51 = arith.constant 0 : index
    %163 = vector.load %arg3[%c20, %c0_51] : memref<32x128xf32, #tpu.memory_space<vmem>>, vector<1x128xf32>
    %c4_i32_52 = arith.constant 4 : i32
    %164 = vector.broadcast %c4_i32_52 : i32 to vector<8x1xi32>
    %165 = arith.cmpi eq, %125, %164 : vector<8x1xi32>
    %166 = arith.extui %165 : vector<8x1xi1> to vector<8x1xi32>
    %167 = arith.sitofp %166 : vector<8x1xi32> to vector<8x1xf32>
    %168 = vector.broadcast %167 : vector<8x1xf32> to vector<8x128xf32>
    %169 = vector.broadcast %163 : vector<1x128xf32> to vector<8x128xf32>
    %170 = arith.mulf %168, %169 : vector<8x128xf32>
    %171 = arith.addf %162, %170 : vector<8x128xf32>
    %c21 = arith.constant 21 : index
    %c0_53 = arith.constant 0 : index
    %172 = vector.load %arg3[%c21, %c0_53] : memref<32x128xf32, #tpu.memory_space<vmem>>, vector<1x128xf32>
    %c5_i32_54 = arith.constant 5 : i32
    %173 = vector.broadcast %c5_i32_54 : i32 to vector<8x1xi32>
    %174 = arith.cmpi eq, %125, %173 : vector<8x1xi32>
    %175 = arith.extui %174 : vector<8x1xi1> to vector<8x1xi32>
    %176 = arith.sitofp %175 : vector<8x1xi32> to vector<8x1xf32>
    %177 = vector.broadcast %176 : vector<8x1xf32> to vector<8x128xf32>
    %178 = vector.broadcast %172 : vector<1x128xf32> to vector<8x128xf32>
    %179 = arith.mulf %177, %178 : vector<8x128xf32>
    %180 = arith.addf %171, %179 : vector<8x128xf32>
    %c22 = arith.constant 22 : index
    %c0_55 = arith.constant 0 : index
    %181 = vector.load %arg3[%c22, %c0_55] : memref<32x128xf32, #tpu.memory_space<vmem>>, vector<1x128xf32>
    %c6_i32_56 = arith.constant 6 : i32
    %182 = vector.broadcast %c6_i32_56 : i32 to vector<8x1xi32>
    %183 = arith.cmpi eq, %125, %182 : vector<8x1xi32>
    %184 = arith.extui %183 : vector<8x1xi1> to vector<8x1xi32>
    %185 = arith.sitofp %184 : vector<8x1xi32> to vector<8x1xf32>
    %186 = vector.broadcast %185 : vector<8x1xf32> to vector<8x128xf32>
    %187 = vector.broadcast %181 : vector<1x128xf32> to vector<8x128xf32>
    %188 = arith.mulf %186, %187 : vector<8x128xf32>
    %189 = arith.addf %180, %188 : vector<8x128xf32>
    %190 = vector.extract_strided_slice %189 {offsets = [0, 0], sizes = [8, 3], strides = [1, 1]} : vector<8x128xf32> to vector<8x3xf32>
    %c0_57 = arith.constant 0 : index
    %c0_58 = arith.constant 0 : index
    %191 = vector.load %arg1[%c0_57, %c0_58] : memref<8x5xf32, #tpu.memory_space<vmem>>, vector<8x5xf32>
    %192 = tpu.concatenate %108, %190, %191 in 1 : vector<8x4xf32>, vector<8x3xf32>, vector<8x5xf32> -> vector<8x12xf32>
    %cst_59 = arith.constant 0.000000e+00 : f32
    %193 = vector.broadcast %cst_59 : f32 to vector<8x4xf32>
    %194 = tpu.concatenate %192, %193 in 1 : vector<8x12xf32>, vector<8x4xf32> -> vector<8x16xf32>
    %c0_60 = arith.constant 0 : index
    %c0_61 = arith.constant 0 : index
    %195 = vector.load %arg2[%c0_60, %c0_61] : memref<80x128xf32, #tpu.memory_space<vmem>>, vector<16x32xf32>
    %cst_62 = arith.constant dense<0.000000e+00> : vector<8x32xf32>
    %196 = tpu.matmul %194, %195, %cst_62 {dimension_numbers = #tpu.dot_dimension_numbers<[1], [0], [0], [1], [0, 0, 1, 1], [], []>} : vector<8x16xf32>, vector<16x32xf32>, vector<8x32xf32> -> vector<8x32xf32>
    %cst_63 = arith.constant dense<0.000000e+00> : vector<32xf32>
    %197 = vector.multi_reduction <add>, %196, %cst_63 [0] : vector<8x32xf32> to vector<32xf32>
    %198 = vector.shape_cast %197 : vector<32xf32> to vector<1x32xf32>
    %cst_64 = arith.constant 8.000000e+00 : f32
    %199 = vector.broadcast %cst_64 : f32 to vector<1x32xf32>
    %200 = arith.divf %198, %199 : vector<1x32xf32>
    %201 = vector.broadcast %200 : vector<1x32xf32> to vector<8x32xf32>
    %202 = arith.subf %196, %201 : vector<8x32xf32>
    %203 = arith.mulf %202, %202 : vector<8x32xf32>
    %cst_65 = arith.constant dense<0.000000e+00> : vector<32xf32>
    %204 = vector.multi_reduction <add>, %203, %cst_65 [0] : vector<8x32xf32> to vector<32xf32>
    %205 = vector.shape_cast %204 : vector<32xf32> to vector<1x32xf32>
    %cst_66 = arith.constant 8.000000e+00 : f32
    %206 = vector.broadcast %cst_66 : f32 to vector<1x32xf32>
    %207 = arith.divf %205, %206 : vector<1x32xf32>
    %cst_67 = arith.constant 9.99999974E-6 : f32
    %208 = vector.broadcast %cst_67 : f32 to vector<1x32xf32>
    %209 = arith.addf %207, %208 : vector<1x32xf32>
    %210 = math.rsqrt %209 : vector<1x32xf32>
    %c24 = arith.constant 24 : index
    %c0_68 = arith.constant 0 : index
    %211 = vector.load %arg3[%c24, %c0_68] : memref<32x128xf32, #tpu.memory_space<vmem>>, vector<1x32xf32>
    %c25 = arith.constant 25 : index
    %c0_69 = arith.constant 0 : index
    %212 = vector.load %arg3[%c25, %c0_69] : memref<32x128xf32, #tpu.memory_space<vmem>>, vector<1x32xf32>
    %213 = arith.mulf %211, %210 : vector<1x32xf32>
    %214 = vector.broadcast %213 : vector<1x32xf32> to vector<8x32xf32>
    %215 = arith.mulf %202, %214 : vector<8x32xf32>
    %216 = vector.broadcast %212 : vector<1x32xf32> to vector<8x32xf32>
    %217 = arith.addf %215, %216 : vector<8x32xf32>
    %cst_70 = arith.constant 1.000000e-01 : f32
    %218 = vector.broadcast %cst_70 : f32 to vector<8x32xf32>
    %219 = arith.mulf %218, %217 : vector<8x32xf32>
    %220 = arith.maximumf %217, %219 : vector<8x32xf32>
    %c16_71 = arith.constant 16 : index
    %c0_72 = arith.constant 0 : index
    %221 = vector.load %arg2[%c16_71, %c0_72] : memref<80x128xf32, #tpu.memory_space<vmem>>, vector<32x32xf32>
    %cst_73 = arith.constant dense<0.000000e+00> : vector<8x32xf32>
    %222 = tpu.matmul %220, %221, %cst_73 {dimension_numbers = #tpu.dot_dimension_numbers<[1], [0], [0], [1], [0, 0, 1, 1], [], []>} : vector<8x32xf32>, vector<32x32xf32>, vector<8x32xf32> -> vector<8x32xf32>
    %cst_74 = arith.constant dense<0.000000e+00> : vector<32xf32>
    %223 = vector.multi_reduction <add>, %222, %cst_74 [0] : vector<8x32xf32> to vector<32xf32>
    %224 = vector.shape_cast %223 : vector<32xf32> to vector<1x32xf32>
    %cst_75 = arith.constant 8.000000e+00 : f32
    %225 = vector.broadcast %cst_75 : f32 to vector<1x32xf32>
    %226 = arith.divf %224, %225 : vector<1x32xf32>
    %227 = vector.broadcast %226 : vector<1x32xf32> to vector<8x32xf32>
    %228 = arith.subf %222, %227 : vector<8x32xf32>
    %229 = arith.mulf %228, %228 : vector<8x32xf32>
    %cst_76 = arith.constant dense<0.000000e+00> : vector<32xf32>
    %230 = vector.multi_reduction <add>, %229, %cst_76 [0] : vector<8x32xf32> to vector<32xf32>
    %231 = vector.shape_cast %230 : vector<32xf32> to vector<1x32xf32>
    %cst_77 = arith.constant 8.000000e+00 : f32
    %232 = vector.broadcast %cst_77 : f32 to vector<1x32xf32>
    %233 = arith.divf %231, %232 : vector<1x32xf32>
    %cst_78 = arith.constant 9.99999974E-6 : f32
    %234 = vector.broadcast %cst_78 : f32 to vector<1x32xf32>
    %235 = arith.addf %233, %234 : vector<1x32xf32>
    %236 = math.rsqrt %235 : vector<1x32xf32>
    %c26 = arith.constant 26 : index
    %c0_79 = arith.constant 0 : index
    %237 = vector.load %arg3[%c26, %c0_79] : memref<32x128xf32, #tpu.memory_space<vmem>>, vector<1x32xf32>
    %c27 = arith.constant 27 : index
    %c0_80 = arith.constant 0 : index
    %238 = vector.load %arg3[%c27, %c0_80] : memref<32x128xf32, #tpu.memory_space<vmem>>, vector<1x32xf32>
    %239 = arith.mulf %237, %236 : vector<1x32xf32>
    %240 = vector.broadcast %239 : vector<1x32xf32> to vector<8x32xf32>
    %241 = arith.mulf %228, %240 : vector<8x32xf32>
    %242 = vector.broadcast %238 : vector<1x32xf32> to vector<8x32xf32>
    %243 = arith.addf %241, %242 : vector<8x32xf32>
    %cst_81 = arith.constant 1.000000e-01 : f32
    %244 = vector.broadcast %cst_81 : f32 to vector<8x32xf32>
    %245 = arith.mulf %244, %243 : vector<8x32xf32>
    %246 = arith.maximumf %243, %245 : vector<8x32xf32>
    %c48 = arith.constant 48 : index
    %c0_82 = arith.constant 0 : index
    %247 = vector.load %arg2[%c48, %c0_82] : memref<80x128xf32, #tpu.memory_space<vmem>>, vector<32x16xf32>
    %cst_83 = arith.constant dense<0.000000e+00> : vector<8x16xf32>
    %248 = tpu.matmul %246, %247, %cst_83 {dimension_numbers = #tpu.dot_dimension_numbers<[1], [0], [0], [1], [0, 0, 1, 1], [], []>} : vector<8x32xf32>, vector<32x16xf32>, vector<8x16xf32> -> vector<8x16xf32>
    %c28 = arith.constant 28 : index
    %c0_84 = arith.constant 0 : index
    %249 = vector.load %arg3[%c28, %c0_84] : memref<32x128xf32, #tpu.memory_space<vmem>>, vector<1x16xf32>
    %250 = vector.broadcast %249 : vector<1x16xf32> to vector<8x16xf32>
    %251 = arith.addf %248, %250 : vector<8x16xf32>
    %cst_85 = arith.constant 0.000000e+00 : f32
    %252 = vector.broadcast %cst_85 : f32 to vector<8x100xf32>
    %253 = tpu.concatenate %192, %251, %252 in 1 : vector<8x12xf32>, vector<8x16xf32>, vector<8x100xf32> -> vector<8x128xf32>
    %c0_86 = arith.constant 0 : index
    %c0_87 = arith.constant 0 : index
    %254 = vector.load %arg4[%c0_86, %c0_87] : memref<8x128xf32, #tpu.memory_space<vmem>>, vector<8x128xf32>
    tpu.vector_store %arg4[%c0_86, %c0_87], %253 {strides = array<i32>} : memref<8x128xf32, #tpu.memory_space<vmem>>, vector<8x128xf32>,
    return
  }
}

</mosaic_0001>

<bundles_post_ra>
// kernel: forward.1
= control target key start
LH: loop header
LB: loop body
LE: loop exit
PB: predicated region body
PF: predicated region fallthrough
CT: control target
= control target key end

     0   :  { %s1055_s0 = inlined_call_operand.vmem [shape: s32[8,2], index: 0, kind: input, shape index: {}]   ;;  %s1056_s1 = inlined_call_operand.vmem [shape: f32[8,5], index: 1, kind: input, shape index: {}]   ;;  %s1057_s2 = inlined_call_operand.hbm [shape: f32[80,128], index: 2, kind: input, shape index: {}]   ;;  %s1058_s3 = inlined_call_operand.hbm [shape: f32[32,128], index: 3, kind: input, shape index: {}]   ;;  %s1059_s4 = inlined_call_operand.vmem [shape: f32[8,128], index: 4, kind: output, shape index: {}]  }
   0x1   :  { %s9_s17 = sshll.u32 %s1055_s0, 4  ;;  %s10_s17 = int_to_ptr.vmem [resolvable:$true] %s9_s17 }
   0x2   :  { %s833_s18 = scalar_lea.vmem %s10_s17, 128  ;;  %p838_p1 = scmp.lt.s32.totalorder %s10_s17, %s10_s17 }
   0x3   :  { %p834_p0 = scmp.ne.s32.totalorder %s10_s17, %s833_s18  ;;  %p839_p2 = scmp.lt.s32.totalorder %s833_s18, %s833_s18 }
   0x5   :  { %p840_p3 = por %p839_p2, %p838_p1 }
   0x7   :  { %p841_p4 = pnand %p840_p3, %p834_p0 }
   0x9   :  { %844 = shalt.err (!%p841_p4)  }
   0xa   :  { %s895_s19 = smov [#allocation3]  }
   0xb   :  { %12 = dma.vmem_to_smem %s10_s17, 128, %s895_s19, [#allocation2] }
   0xc   :  { %889 = dma.done.wait [#allocation2], 128 }
   0xd   :  { %890 = vsyncadd [#allocation2], 4294967168 }
   0xe   :  { %14 = sfence }
   0xf   :  { %15 = vsyncpa [#allocation5], 0 }
  0x10   :  { %16 = vsyncpa [#allocation7], 0  ;;  %s896_s20 = smov [#allocation4]   ;;  %s845_s23 = scalar_lea.hbm %s1057_s2, 1280 }
  0x11   :  { %s24_s21 = sshll.u32 %s896_s20, 4  ;;  %p846_p5 = scmp.ne.s32.totalorder %s1057_s2, %s845_s23  ;;  %s25_s21 = int_to_ptr.vmem [resolvable:$true] %s24_s21 }
  0x12   :  { %p849_p6 = scmp.lt.u32.totalorder %s845_s23, %s1057_s2 }
  0x14   :  { %p851_p7 = pnand %p849_p6, %p846_p5 }
  0x16   :  { %854 = shalt.err (!%p851_p7)
}
  0x17   :  { %s855_s28 = scalar_lea.vmem %s25_s21, 1280  ;;  %p860_p9 = scmp.lt.s32.totalorder %s25_s21, %s25_s21 }
  0x18   :  { %p856_p8 = scmp.ne.s32.totalorder %s25_s21, %s855_s28  ;;  %p861_p10 = scmp.lt.s32.totalorder %s855_s28, %s855_s28 }
  0x1a   :  { %p862_p11 = por %p861_p10, %p860_p9 }
  0x1c   :  { %p863_p12 = pnand %p862_p11, %p856_p8 }
  0x1e   :  { %866 = shalt.err (!%p863_p12)
}
  0x1f   :  { %s897_s29 = smov 128   ;;  %s898_s30 = smov 8  }
  0x20   :  { %30 = dma.hbm_to_vmem [thread:$0]  %s1057_s2, 1280, %s25_s21, [#allocation5], %s897_s29, %s897_s29, %s898_s30  }
  0x21   :  { %s899_s7 = smov [#allocation6]   ;;  %s867_s11 = scalar_lea.hbm %s1058_s3, 512 }
  0x22   :  { %s36_s8 = sshll.u32 %s899_s7, 4  ;;  %p868_p13 = scmp.ne.s32.totalorder %s1058_s3, %s867_s11  ;;  %s37_s8 = int_to_ptr.vmem [resolvable:$true] %s36_s8 }
  0x23   :  { %p871_p0 = scmp.lt.u32.totalorder %s867_s11, %s1058_s3 }
  0x25   :  { %p873_p1 = pnand %p871_p0, %p868_p13 }
  0x27   :  { %876 = shalt.err (!%p873_p1)
}
  0x28   :  { %s877_s16 = scalar_lea.vmem %s37_s8, 512  ;;  %p882_p3 = scmp.lt.s32.totalorder %s37_s8, %s37_s8 }
  0x29   :  { %p878_p2 = scmp.ne.s32.totalorder %s37_s8, %s877_s16  ;;  %p883_p4 = scmp.lt.s32.totalorder %s877_s16, %s877_s16 }
  0x2b   :  { %p884_p5 = por %p883_p4, %p882_p3 }
  0x2d   :  { %p885_p6 = pnand %p884_p5, %p878_p2 }
  0x2f   :  { %888 = shalt.err (!%p885_p6)
}
  0x30   :  { %42 = dma.hbm_to_vmem [thread:$0]  %s1058_s3, 512, %s37_s8, [#allocation7], %s897_s29, %s897_s29, %s898_s30  }
  0x31   :  { %891 = dma.done.wait [#allocation5], 1280  }
  0x32   :  { %892 = vsyncadd [#allocation5], 4294966016 }
  0x33   :  { %893 = dma.done.wait [#allocation7], 512  }
  0x34   :  { %894 = vsyncadd [#allocation7], 4294966784  ;;  %v900_v0 = vmov 0   ;;  %s720_s18 = sld [smem:[#allocation3 + $0x1]]  ;;  %s967_s3 = sld [smem:[#allocation3]]  ;;  %vm65_vm0 = vcmask 1040384  }
  0x35   :  { %823 = vset.pattern.permute.xlu1 %v900_v0  ;;  %817 = vset.pattern.permute.xlu0 %v900_v0  ;;  %s721_s19 = sld [smem:[#allocation3 + $0x81]]  ;;  %s969_s25 = sld [smem:[#allocation3 + $0x80]]  ;;  %vm67_vm1 = vcmask 1041408   ;;  %vm69_vm2 = vcmask 1042432   ;;  %vm71_vm3 = vcmask 1043456   ;;  %vm73_vm4 = vcmask 1044480  }
  0x36   :  { %s722_s20 = sld [smem:[#allocation3 + $0x101]]  ;;  %s971_s26 = sld [smem:[#allocation3 + $0x100]]  ;;  %vm75_vm5 = vcmask 1045504   ;;  %vm77_vm6 = vcmask 1046528   ;;  %v901_v28 = vmov 0.0   ;;  %v357_v51 = vld [vmem:[%s1056_s1] sm:$0xff] }
  0x37   :  { %s723_s21 = sld [smem:[#allocation3 + $0x181]]  ;;  %s973_s27 = sld [smem:[#allocation3 + $0x180]]  ;;  %v903_v52 = vmov 0.0|0.0   ;;  %v729_v54 = vld [vmem:[#allocation6 + $0x10] ss:$0 sm:$0xff]  ;;  %v373_v60 = vld [vmem:[#allocation4 + $0x8] sm:$0xff] }
  0x38   :  { %s959_s22 = sld [smem:[#allocation3 + $0x201]]  ;;  %s975_s28 = sld [smem:[#allocation3 + $0x200]]  ;;  %790 = vmatprep.subr.bf16.mxu0 %v903_v52  ;;  %793 = vmatprep.subr.bf16.mxu1 %v903_v52  ;;  %v731_v55 = vld [vmem:[#allocation6 + $0x11] ss:$0 sm:$0xff]  ;;  %v733_v61 = vld [vmem:[#allocation6 + $0x12] ss:$0 sm:$0xff] }
  0x39   :  { %s961_s0 = sld [smem:[#allocation3 + $0x281]]  ;;  %s977_s29 = sld [smem:[#allocation3 + $0x280]]  ;;  %v372_v59 = vld [vmem:[#allocation4] sm:$0xff] }
  0x3a   :  { %s963_s23 = sld [smem:[#allocation3 + $0x301]]  ;;  %v230_v1 = vstv %s720_s18  ;;  %s979_s30 = sld [smem:[#allocation3 + $0x300]]  ;;  %v50_v11 = vstv %s967_s3  ;;  %v791_v62 = vpack.c.bf16 %v373_v60, %v372_v59 }
  0x3b   :  { %s965_s24 = sld [smem:[#allocation3 + $0x381]]  ;;  %v232_v2 = vstv %s721_s19  ;;  %s983_s5 = sld [smem:[#allocation3 + $0x380]]  ;;  %v52_v14 = vstv %s969_s25 }
  0x3c   :  { %v234_v3 = vstv %s722_s20  ;;  %v245_v6 = vsel %vm65_vm0, %v230_v1, %v232_v2  ;;  %v54_v15 = vstv %s971_s26  ;;  %v66_v19 = vsel %vm65_vm0, %v50_v11, %v52_v14  ;;  %s902_s8 = smov 7   ;;  %v735_v1 = vld [vmem:[#allocation6 + $0x13] ss:$0 sm:$0xff]  ;;  %792 = vmatpush3.bf16.msra.mxu0 %v791_v62  ;;  %s905_s1 = smov 4  }
  0x3d   :  { %v236_v4 = vstv %s723_s21  ;;  %v246_v8 = vsel %vm67_vm1, %v245_v6, %v234_v3  ;;  %v56_v17 = vstv %s973_s27  ;;  %v68_v22 = vsel %vm67_vm1, %v66_v19, %v54_v15  ;;  %799 = vmatprep.subr.bf16.mxu0 %v903_v52  ;;  %v737_v6 = vld [vmem:[#allocation6 + $0x14] ss:$0 sm:$0xff]  ;;  %s906_s9 = smov 12  }
  0x3e   :  { %v238_v5 = vstv %s959_s22  ;;  %v247_v10 = vsel %vm69_vm2, %v246_v8, %v236_v4  ;;  %v58_v18 = vstv %s975_s28  ;;  %v70_v26 = vsel %vm69_vm2, %v68_v22, %v56_v17 }
  0x3f   :  { %v240_v7 = vstv %s961_s0  ;;  %v248_v13 = vsel %vm71_vm3, %v247_v10, %v238_v5  ;;  %v60_v21 = vstv %s977_s29  ;;  %v72_v27 = vsel %vm71_vm3, %v70_v26, %v58_v18 }
  0x40   :  { %v242_v9 = vstv %s963_s23  ;;  %v249_v16 = vsel %vm73_vm4, %v248_v13, %v240_v7  ;;  %v62_v24 = vstv %s979_s30  ;;  %v74_v30 = vsel %vm73_vm4, %v72_v27, %v60_v21  ;;  %v741_v13 = vld [vmem:[#allocation6 + $0x16] ss:$0 sm:$0xff]  ;;  %v705_v27 = vld [vmem:[#allocation6 + $0x2] ss:$0 sm:$0xff] }
  0x41   :  { %v244_v12 = vstv %s965_s24  ;;  %v250_v20 = vsel %vm75_vm5, %v249_v16, %v242_v9  ;;  %v64_v25 = vstv %s983_s5  ;;  %v76_v33 = vsel %vm75_vm5, %v74_v30, %v62_v24  ;;  %v739_v9 = vld [vmem:[#allocation6 + $0x15] ss:$0 sm:$0xff]  ;;  %v703_v24 = vld [vmem:[#allocation6 + $0x1] ss:$0 sm:$0xff] }
  0x42   :  { %v251_v23 = vsel %vm77_vm6, %v250_v20, %v244_v12  ;;  %v78_v35 = vsel %vm77_vm6, %v76_v33, %v64_v25 }
  0x43   :  { %vm298_vm7 = vcmp.eq.s32.totalorder %v251_v23, 3  ;;  %vm253_vm8 = vcmp.eq.s32.totalorder %v251_v23, 0  ;;  %vm268_vm9 = vcmp.eq.s32.totalorder %v251_v23, 1  ;;  %vm313_vm10 = vcmp.eq.s32.totalorder %v251_v23, 4 }
  0x44   :  { %v734_v29 = vsel %vm298_vm7, 1.0, %v901_v28  ;;  %v728_v31 = vsel %vm253_vm8, 1.0, %v901_v28  ;;  %v730_v32 = vsel %vm268_vm9, 1.0, %v901_v28  ;;  %vm283_vm11 = vcmp.eq.s32.totalorder %v251_v23, 2 }
  0x45   :  { %303 = vperm.xlu1 %823, %v734_v29   ;;  %v818_v34 = vpack.i.bf16 %v730_v32, %v728_v31  ;;  %v736_v36 = vsel %vm313_vm10, 1.0, %v901_v28  ;;  %vm343_vm12 = vcmp.eq.s32.totalorder %v251_v23, 6  ;;  %v732_v37 = vsel %vm283_vm11, 1.0, %v901_v28  ;;  %v707_v32 = vld [vmem:[#allocation6 + $0x3] ss:$0 sm:$0xff] }
  0x46   :  { %vm328_vm13 = vcmp.eq.s32.totalorder %v251_v23, 5  ;;  %vm80_vm14 = vcmp.eq.s32.totalorder %v78_v35, 0  ;;  %vm95_vm15 = vcmp.eq.s32.totalorder %v78_v35, 1  ;;  %v740_v38 = vsel %vm343_vm12, 1.0, %v901_v28  ;;  %v701_v23 = vld [vmem:[#allocation6] ss:$0 sm:$0xff] }
  0x47   :  { %819 = vperm.xlu0 %817, %v818_v34   ;;  %vm110_vm0 = vcmp.eq.s32.totalorder %v78_v35, 2  ;;  %v738_v39 = vsel %vm328_vm13, 1.0, %v901_v28  ;;  %v700_v40 = vsel %vm80_vm14, 1.0, %v901_v28  ;;  %v702_v41 = vsel %vm95_vm15, 1.0, %v901_v28 }
  0x48   :  { %v704_v42 = vsel %vm110_vm0, 1.0, %v901_v28  ;;  %v824_v43 = vpack.i.bf16 %v702_v41, %v700_v40  ;;  %vm140_vm1 = vcmp.eq.s32.totalorder %v78_v35, 4  ;;  %vm125_vm2 = vcmp.eq.s32.totalorder %v78_v35, 3  ;;  %v711_v40 = vld [vmem:[#allocation6 + $0x5] ss:$0 sm:$0xff] }
  0x49   :  { %318 = vperm.xlu1 %823, %v736_v36   ;;  %v708_v44 = vsel %vm140_vm1, 1.0, %v901_v28  ;;  %vm170_vm3 = vcmp.eq.s32.totalorder %v78_v35, 6  ;;  %v706_v45 = vsel %vm125_vm2, 1.0, %v901_v28  ;;  %vm155_vm4 = vcmp.eq.s32.totalorder %v78_v35, 5  ;;  %v709_v36 = vld [vmem:[#allocation6 + $0x4] ss:$0 sm:$0xff] }
  0x4a   :  { %v712_v46 = vsel %vm170_vm3, 1.0, %v901_v28  ;;  %vm200_vm5 = vcmp.eq.s32.totalorder %v78_v35, 8  ;;  %v710_v47 = vsel %vm155_vm4, 1.0, %v901_v28  ;;  %vm185_vm6 = vcmp.eq.s32.totalorder %v78_v35, 7 }
  0x4b   :  { %288 = vperm.xlu0 %817, %v732_v37   ;;  %v716_v48 = vsel %vm200_vm5, 1.0, %v901_v28  ;;  %v714_v49 = vsel %vm185_vm6, 1.0, %v901_v28  ;;  %vm215_vm7 = vcmp.eq.s32.totalorder %v78_v35, 9  ;;  %vm904_vm8 = vmmov 0  }
  0x4c   :  { %v718_v50 = vsel %vm215_vm7, 1.0, %v901_v28  ;;  %765 = vmatprep.mubr.msk.f32.mxu0 %vm904_vm8, %v901_v28  ;;  %776 = vmatprep.mubr.msk.f32.mxu1 %vm904_vm8, %v901_v28  ;;  %vm366_vm9 = vcmask 31744   ;;  %vm368_vm10 = vcmask 56320   ;;  %vm370_vm11 = vcmask 97280  }
  0x4d   :  { %348 = vperm.xlu1 %823, %v740_v38   ;;  %vm374_vm12 = vcmask 130048   ;;  %vm448_vm13 = vcmask 261120   ;;  %vm684_vm14 = vcmask 228352  }
  0x4f   :  { %333 = vperm.xlu0 %817, %v738_v39  }
  0x51   :  { %115 = vperm.xlu1 %823, %v704_v42  }
  0x53   :  { %825 = vperm.xlu0 %817, %v824_v43  }
  0x55   :  { %145 = vperm.xlu1 %823, %v708_v44   ;;  %v713_v44 = vld [vmem:[#allocation6 + $0x6] ss:$0 sm:$0xff] }
  0x57   :  { %130 = vperm.xlu0 %817, %v706_v45  }
  0x59   :  { %175 = vperm.xlu1 %823, %v712_v46  }
  0x5b   :  { %160 = vperm.xlu0 %817, %v710_v47  }
  0x5d   :  { %205 = vperm.xlu1 %823, %v716_v48   ;;  %v715_v48 = vld [vmem:[#allocation6 + $0x7] ss:$0 sm:$0xff] }
  0x5f   :  { %190 = vperm.xlu0 %817, %v714_v49  }
  0x63   :  { %220 = vperm.xlu0 %817, %v718_v50  }
  0x67   :  { %363 = vrot.lane.b32.xlu0 %v357_v51, %s902_s8 }
  0xc4   :  { %v304_v53 = vpop.permute.xlu1 %303 }
  0xc5   :  { %v310_v7 = vmul.f32 %v735_v1, %v304_v53  ;;  %v717_v53 = vld [vmem:[#allocation6 + $0x8] ss:$0 sm:$0xff] }
  0xc6   :  { %v820_v56 = vpop.permute.xlu0 %819 }
  0xc7   :  { %v822_v57 = vunpack.i.h.bf16 %v820_v56  ;;  %v821_v58 = vunpack.i.l.bf16 %v820_v56 }
  0xc8   :  { %v319_v2 = vpop.permute.xlu1 %318 }
  0xc9   :  { %v280_v63 = vmul.f32 %v822_v57, %v731_v55  ;;  %v265_v0 = vmul.f32 %v821_v58, %v729_v54  ;;  %v325_v11 = vmul.f32 %v737_v6, %v319_v2  ;;  %v719_v57 = vld [vmem:[#allocation6 + $0x9] ss:$0 sm:$0xff]  ;;  %v487_v6 = vld [vmem:[#allocation4 + $0x20] sm:$0xff] }
  0xca   :  { %v289_v3 = vpop.permute.xlu0 %288 }
  0xcb   :  { %v281_v4 = vadd.f32 %v280_v63, %v265_v0  ;;  %v295_v5 = vmul.f32 %v733_v61, %v289_v3  ;;  %v485_v3 = vld [vmem:[#allocation4 + $0x10] sm:$0xff] }
  0xcc   :  { %v349_v14 = vpop.permute.xlu1 %348 }
  0xcd   :  { %v296_v8 = vadd.f32 %v295_v5, %v281_v4  ;;  %v355_v17 = vmul.f32 %v741_v13, %v349_v14  ;;  %v486_v4 = vld [vmem:[#allocation4 + $0x18] sm:$0xff] }
  0xce   :  { %v334_v10 = vpop.permute.xlu0 %333  ;;  %v794_v5 = vpack.c.bf16 %v486_v4, %v485_v3 }
  0xcf   :  { %v311_v12 = vadd.f32 %v310_v7, %v296_v8  ;;  %v340_v16 = vmul.f32 %v739_v9, %v334_v10  ;;  %v488_v7 = vld [vmem:[#allocation4 + $0x28] sm:$0xff] }
  0xd0   :  { %v116_v29 = vpop.permute.xlu1 %115  ;;  %795 = vmatpush3.bf16.msra.mxu1 %v794_v5  ;;  %v797_v8 = vpack.c.bf16 %v488_v7, %v487_v6  ;;  %v582_v6 = vld [vmem:[#allocation6 + $0x1a] sm:$0x1] }
  0xd1   :  { %v326_v15 = vadd.f32 %v325_v11, %v311_v12  ;;  %v122_v31 = vmul.f32 %v705_v27, %v116_v29  ;;  %796 = vmatprep.subr.bf16.mxu1 %v903_v52 }
  0xd2   :  { %v826_v20 = vpop.permute.xlu0 %825 }
  0xd3   :  { %v341_v18 = vadd.f32 %v340_v16, %v326_v15  ;;  %v828_v21 = vunpack.i.h.bf16 %v826_v20  ;;  %v827_v22 = vunpack.i.l.bf16 %v826_v20 }
  0xd4   :  { %v146_v37 = vpop.permute.xlu1 %145  ;;  %798 = vmatpush3.bf16.msra.mxu1 %v797_v8 }
  0xd5   :  { %v356_v19 = vadd.f32 %v355_v17, %v341_v18  ;;  %v107_v25 = vmul.f32 %v828_v21, %v703_v24  ;;  %v92_v26 = vmul.f32 %v827_v22, %v701_v23  ;;  %v152_v39 = vmul.f32 %v709_v36, %v146_v37  ;;  %v743_v37 = vld [vmem:[#allocation6 + $0x19] ss:$0 sm:$0xff] }
  0xd6   :  { %v131_v33 = vpop.permute.xlu0 %130 }
  0xd7   :  { %359 = vrot.lane.b32.xlu1 %v356_v19, %s905_s1  ;;  %v108_v30 = vadd.f32 %v107_v25, %v92_v26  ;;  %v137_v35 = vmul.f32 %v707_v32, %v131_v33  ;;  %v470_v32 = vld [vmem:[#allocation6 + $0x18] sm:$0x1] }
  0xd8   :  { %v176_v45 = vpop.permute.xlu1 %175 }
  0xd9   :  { %v123_v34 = vadd.f32 %v122_v31, %v108_v30  ;;  %v182_v47 = vmul.f32 %v713_v44, %v176_v45  ;;  %v473_v30 = vlaneseq  ;;  %v599_v45 = vld [vmem:[#allocation4 + $0x40] sm:$0xff] }
  0xda   :  { %v161_v41 = vpop.permute.xlu0 %160 }
  0xdb   :  { %v138_v38 = vadd.f32 %v137_v35, %v123_v34  ;;  %v167_v43 = vmul.f32 %v711_v40, %v161_v41  ;;  %v474_v31 = vshrl.u32 %v473_v30, 7 }
  0xdc   :  { %v206_v54 = vpop.permute.xlu1 %205 }
  0xdd   :  { %v153_v42 = vadd.f32 %v152_v39, %v138_v38  ;;  %v212_v56 = vmul.f32 %v717_v53, %v206_v54  ;;  %v475_v33 = vsub.s32 0, %v474_v31 }
  0xde   :  { %v191_v49 = vpop.permute.xlu0 %190 }
  0xdf   :  { %v168_v46 = vadd.f32 %v167_v43, %v153_v42  ;;  %v197_v51 = vmul.f32 %v715_v48, %v191_v49  ;;  %v597_v42 = vld [vmem:[#allocation4 + $0x30] sm:$0xff]  ;;  %v598_v43 = vld [vmem:[#allocation4 + $0x38] sm:$0xff] }
  0xe0   :  { %v800_v44 = vpack.c.bf16 %v598_v43, %v597_v42 }
  0xe1   :  { %v183_v50 = vadd.f32 %v182_v47, %v168_v46  ;;  %v600_v46 = vld [vmem:[#allocation4 + $0x48] sm:$0xff] }
  0xe2   :  { %v221_v58 = vpop.permute.xlu0 %220  ;;  %v803_v47 = vpack.c.bf16 %v600_v46, %v599_v45 }
  0xe3   :  { %v198_v55 = vadd.f32 %v197_v51, %v183_v50  ;;  %v227_v60 = vmul.f32 %v719_v57, %v221_v58 }
  0xe5   :  { %v213_v59 = vadd.f32 %v212_v56, %v198_v55 }
  0xe6   :  { %v364_v62 = vpop.permute.xlu0 %363 }
  0xe7   :  { %v228_v61 = vadd.f32 %v227_v60, %v213_v59 }
 0x149   :  { %v360_v63 = vpop.permute.xlu1 %359 }
 0x14a   :  { %v367_v0 = vsel %vm366_vm9, %v228_v61, %v360_v63 }
 0x14b   :  { %v1036_v1 = vsel %vm368_vm10, %v367_v0, %v364_v62 }
 0x14c   :  { %v371_v2 = vsel %vm370_vm11, %v1036_v1, 0.0 }
 0x14d   :  { %766 = vmatmul.mubr.msk.f32.vlgmr.msra.gmra.mrb[0].mxu0 %vm374_vm12, %v371_v2 }
 0x14e   :  { %787 = vmatprep.mubr.msk.f32.mxu0 %vm904_vm8, %v901_v28  ;;  %801 = vmatpush3.bf16.msra.mxu0 %v800_v44 }
 0x14f   :  { %802 = vmatprep.subr.bf16.mxu0 %v903_v52 }
 0x152   :  { %804 = vmatpush3.bf16.msra.mxu0 %v803_v47 }
 0x220   :  { %v444_v9 = vpop.f32.mrb[0].mxu0 }
 0x221   :  { %v449_v10 = vsel %vm448_vm13, %v444_v9, 0.0  ;;  %v767_v11 = vpop.f32.mrb[1].mxu0 }
 0x222   :  { %v450_v12 = vrot.slane %v449_v10, 4 }
 0x224   :  { %v451_v13 = vadd.f32 %v450_v12, %v449_v10  ;;  %v745_v10 = vld [vmem:[#allocation6 + $0x1b] ss:$0 sm:$0xff] }
 0x226   :  { %v452_v14 = vrot.slane %v451_v13, 2 }
 0x228   :  { %v453_v15 = vadd.f32 %v452_v14, %v451_v13 }
 0x22a   :  { %v454_v28 = vrot.slane %v453_v15, 1 }
 0x22c   :  { %v455_v16 = vadd.f32 %v454_v28, %v453_v15  ;;  %v746_v15 = vld [vmem:[#allocation6 + $0x1c] ss:$0 sm:$0xff] }
 0x22e   :  { %v457_v17 = vmul.f32 0.125, %v455_v16 }
 0x230   :  { %v458_v18 = vsub.f32 %v444_v9, %v457_v17 }
 0x232   :  { %v459_v19 = vmul.f32 %v458_v18, %v458_v18 }
 0x234   :  { %v460_v20 = vsel %vm448_vm13, %v459_v19, 0.0 }
 0x235   :  { %v461_v21 = vrot.slane %v460_v20, 4 }
 0x237   :  { %v462_v22 = vadd.f32 %v461_v21, %v460_v20 }
 0x239   :  { %v463_v23 = vrot.slane %v462_v22, 2 }
 0x23b   :  { %v464_v24 = vadd.f32 %v463_v23, %v462_v22 }
 0x23d   :  { %v465_v25 = vrot.slane %v464_v24, 1 }
 0x23f   :  { %v466_v26 = vadd.f32 %v465_v25, %v464_v24 }
 0x241   :  { %v467_v27 = vmul.f32 0.125, %v466_v26 }
 0x243   :  { %v468_v29 = vadd.f32 1e-05, %v467_v27 }
 0x245   :  { %829 = vrsqrt.f32 %v468_v29 }
 0x24f   :  { %v830_v34 = vpop.eup %829 }
 0x250   :  { %v472_v35 = vmul.f32 %v830_v34, %v470_v32 }
 0x252   :  { %v476_v36 = vrot.slane %v472_v35, %v475_v33 }
 0x254   :  { %v477_v38 = vmul.f32 %v476_v36, %v458_v18 }
 0x256   :  { %v482_v39 = vadd.f32 %v743_v37, %v477_v38 }
 0x258   :  { %v483_v40 = vmul.f32 0.1, %v482_v39 }
 0x25a   :  { %v484_v41 = vmax.f32 %v482_v39, %v483_v40 }
 0x25c   :  { %777 = vmatmul.mubr.msk.f32.vlgmr.msra.gmra.mrb[0].mxu1 %vm448_vm13, %v484_v41 }
 0x32f   :  { %v558_v48 = vpop.f32.mrb[0].mxu1 }
 0x330   :  { %v562_v49 = vsel %vm448_vm13, %v558_v48, 0.0  ;;  %v778_v50 = vpop.f32.mrb[1].mxu1 }
 0x331   :  { %v563_v51 = vrot.slane %v562_v49, 4 }
 0x333   :  { %v564_v53 = vadd.f32 %v563_v51, %v562_v49 }
 0x335   :  { %v565_v54 = vrot.slane %v564_v53, 2 }
 0x337   :  { %v566_v55 = vadd.f32 %v565_v54, %v564_v53 }
 0x339   :  { %v567_v56 = vrot.slane %v566_v55, 1 }
 0x33b   :  { %v568_v57 = vadd.f32 %v567_v56, %v566_v55 }
 0x33d   :  { %v569_v58 = vmul.f32 0.125, %v568_v57 }
 0x33f   :  { %v570_v59 = vsub.f32 %v558_v48, %v569_v58 }
 0x341   :  { %v571_v60 = vmul.f32 %v570_v59, %v570_v59 }
 0x343   :  { %v572_v61 = vsel %vm448_vm13, %v571_v60, 0.0 }
 0x344   :  { %v573_v52 = vrot.slane %v572_v61, 4 }
 0x346   :  { %v574_v62 = vadd.f32 %v573_v52, %v572_v61 }
 0x348   :  { %v575_v63 = vrot.slane %v574_v62, 2 }
 0x34a   :  { %v576_v0 = vadd.f32 %v575_v63, %v574_v62 }
 0x34c   :  { %v577_v2 = vrot.slane %v576_v0, 1 }
 0x34e   :  { %v578_v3 = vadd.f32 %v577_v2, %v576_v0 }
 0x350   :  { %v579_v4 = vmul.f32 0.125, %v578_v3 }
 0x352   :  { %v580_v5 = vadd.f32 1e-05, %v579_v4 }
 0x354   :  { %831 = vrsqrt.f32 %v580_v5 }
 0x35e   :  { %v832_v7 = vpop.eup %831 }
 0x35f   :  { %v584_v8 = vmul.f32 %v832_v7, %v582_v6 }
 0x361   :  { %v588_v9 = vrot.slane %v584_v8, %v475_v33 }
 0x363   :  { %v589_v11 = vmul.f32 %v588_v9, %v570_v59 }
 0x365   :  { %v594_v12 = vadd.f32 %v745_v10, %v589_v11 }
 0x367   :  { %v595_v13 = vmul.f32 0.1, %v594_v12 }
 0x369   :  { %v596_v14 = vmax.f32 %v594_v12, %v595_v13 }
 0x36b   :  { %788 = vmatmul.mubr.msk.f32.vlgmr.msra.gmra.mrb[2].mxu0 %vm448_vm13, %v596_v14 }
 0x43e   :  { %v675_v28 = vpop.f32.mrb[2].mxu0 }
 0x43f   :  { %v676_v16 = vadd.f32 %v746_v15, %v675_v28  ;;  %v789_v17 = vpop.f32.mrb[3].mxu0 }
 0x441   :  { %680 = vrot.lane.b32.xlu1 %v676_v16, %s906_s9 }
 0x4b3   :  { %v681_v18 = vpop.permute.xlu1 %680 }
 0x4b4   :  { %v683_v19 = vsel %vm370_vm11, %v1036_v1, %v681_v18 }
 0x4b5   :  { %v685_v20 = vsel %vm684_vm14, %v683_v19, 0.0 }
 0x4b6   :  { %686 = vst [vmem:[%s1059_s4] sm:$0xff] %v685_v20 }
 0x4b7   :  { %691 = vsyncpa [#allocation5], 1 }
 0x4b8   :  { %692 = vsyncpa [#allocation7], 1 }

</bundles_post_ra>
